<compile_context>
chip_gen: v6e
topology: v6e:2x2x1
jax: 0.10.0
libtpu: 0.0.40
codegen_flags: <defaults>
</compile_context>

<pallas_src>
import jax
import jax.numpy as jnp
from jax.experimental import pallas as pl
from jax.experimental.pallas import tpu as pltpu

LANE = 128            # vreg lane width
SUBLANE = 8           # f32 sublanes per vreg
MAX_TILE_ROWS = 8192  # 8192 x 128 f32 = 4 MiB per buffer (8 MiB double-buffered)
NUM_CORES = 2         # v7x megacore split; at most one redundant (masked) block elsewhere


def _make_sum_kernel(tile_rows, rows, num_blocks, blocks_per_core):
    """Build the tiled streaming-sum kernel for a given static tiling."""
    all_blocks_full = (num_blocks * tile_rows == rows) and (
        num_blocks == NUM_CORES * blocks_per_core)

    def kernel(coef_ref, x_ref, out_ref, acc_ref):
        c = pl.program_id(0)  # core (parallel) axis
        j = pl.program_id(1)  # reduction axis

        @pl.when(j == 0)
        def _init():
            acc_ref[...] = jnp.zeros_like(acc_ref)

        # Load the tile in its native dtype, widen on the VPU.
        xt = x_ref[...].astype(jnp.float32)  # (tile_rows, LANE)

        def _accumulate(tile):
            # (tile_rows,128) -> (tile_rows//8, 8, 128); the axis-0 sum is pure
            # VPU vadds onto the vreg-shaped accumulator (no per-step XLU work).
            acc_ref[...] += tile.reshape(tile_rows // SUBLANE, SUBLANE, LANE).sum(axis=0)

        if all_blocks_full:
            _accumulate(xt)
        else:
            g = c * blocks_per_core + j                 # logical (unclamped) block id
            is_full = (g + 1) * tile_rows <= rows

            @pl.when(is_full)
            def _full():
                _accumulate(xt)

            @pl.when(jnp.logical_not(is_full))
            def _edge():
                # Mask rows past the end of x. Covers the partial last block and
                # the clamped duplicate block a core may get when num_blocks is
                # not a multiple of NUM_CORES * blocks_per_core.
                row = jax.lax.broadcasted_iota(jnp.int32, xt.shape, 0) + g * tile_rows
                _accumulate(jnp.where(row < rows, xt, 0.0))

        @pl.when(j == blocks_per_core - 1)
        def _finalize():
            total = jnp.sum(acc_ref[...])               # one cross-lane reduce per core
            out_ref[...] = (total * coef_ref[0]).reshape(1, 1, 1)

    return kernel


def foo_forward(x, w1, w2, w3, w4):
    """Exact forward of Foo: (x@w1@w3).sum() + (x@w2@w4).sum(), as a Pallas kernel."""
    # Fold the four rank-1 matmuls into a single scalar coefficient (tiny JAX ops).
    coef = ((w1 @ w3)[0, 0] + w2[0, 0] * jnp.sum(w4)).astype(jnp.float32)
    coef_smem = coef.reshape(1)

    xf = x.reshape(-1)                   # free: x is contiguous with last dim 1
    n = int(xf.shape[0])

    rows = n // LANE
    tail = n - rows * LANE
    tail_sum = jnp.zeros((), jnp.float32)

    if rows == 0:
        # Fewer than 128 elements: zero-pad to a single lane-dense row (tiny copy).
        x2d = jnp.pad(xf, (0, LANE - n)).reshape(1, LANE)
        rows = 1
    elif tail:
        # Handle only the <128-element tail in the wrapper; the bulk streams
        # through the kernel in its native dtype.
        # TODO(synk): the prefix slice below may still materialize a copy when
        # n % 128 != 0; a manual-DMA (memory_space=pl.ANY) path would avoid it.
        tail_sum = jnp.sum(xf[rows * LANE:].astype(jnp.float32))
        x2d = xf[: rows * LANE].reshape(rows, LANE)
    else:
        x2d = xf.reshape(rows, LANE)     # free reshape, no copy

    tile_rows = min(MAX_TILE_ROWS, ((rows + SUBLANE - 1) // SUBLANE) * SUBLANE)
    num_blocks = -(-rows // tile_rows)
    blocks_per_core = -(-num_blocks // NUM_CORES)

    kernel = _make_sum_kernel(tile_rows, rows, num_blocks, blocks_per_core)

    def x_index_map(c, j):
        # Clamp so a core's trailing "extra" block never DMAs past the array; the
        # kernel masks its contribution to zero via the logical block id.
        return (jnp.minimum(c * blocks_per_core + j, num_blocks - 1), 0)

    itemsize = jnp.dtype(x2d.dtype).itemsize
    partials = pl.pallas_call(
        kernel,
        out_shape=jax.ShapeDtypeStruct((NUM_CORES, 1, 1), jnp.float32),
        grid=(NUM_CORES, blocks_per_core),
        in_specs=[
            pl.BlockSpec(memory_space=pltpu.MemorySpace.SMEM),   # folded coef scalar
            pl.BlockSpec((tile_rows, LANE), x_index_map),        # x tiles (native dtype)
        ],
        out_specs=pl.BlockSpec((1, 1, 1), lambda c, j: (c, 0, 0)),
        scratch_shapes=[pltpu.VMEM((SUBLANE, LANE), jnp.float32)],
        compiler_params=pltpu.CompilerParams(
            dimension_semantics=("parallel", "arbitrary"),
            vmem_limit_bytes=32 * 1024 * 1024,
        ),
        cost_estimate=pl.CostEstimate(
            flops=rows * LANE, transcendentals=0,
            bytes_accessed=rows * LANE * itemsize,
        ),
    )(coef_smem, x2d)

    # Sum the per-core partials and add the (already tiny) tail contribution.
    return jnp.sum(partials) + coef * tail_sum


def foo_reference(x, w1, w2, w3, w4):
    t1 = x @ w1
    t2 = x @ w2
    t3 = t1 @ w3
    t4 = t2 @ w4
    return jnp.sum(t3) + jnp.sum(t4)


if __name__ == "__main__":
    key = jax.random.PRNGKey(0)

    # Parameters: initialized exactly as in Foo.__init__ (all ones).
    w1 = jnp.ones((1, 10), dtype=jnp.float32)
    w2 = jnp.ones((1, 1), dtype=jnp.float32)
    w3 = jnp.ones((10, 1), dtype=jnp.float32)
    w4 = jnp.ones((1, 10), dtype=jnp.float32)

    k1, k2 = jax.random.split(key)

    # Small case (module-typical tiny input; last dim must be 1).
    x_small = jax.random.normal(k1, (8, 1), dtype=jnp.float32)
    out_small = foo_forward(x_small, w1, w2, w3, w4)
    jax.block_until_ready(out_small)
    ref_small = foo_reference(x_small, w1, w2, w3, w4)
    assert jnp.allclose(out_small, ref_small, rtol=1e-5, atol=1e-5), (out_small, ref_small)

    # Larger case exercising: multi-block grid, the 2-core split, a partial last
    # block (rows % tile_rows != 0), a clamped duplicate block, and the <128 tail.
    n_big = 2 * MAX_TILE_ROWS * LANE + 5 * LANE + 77      # 2,097,869 elements
    x_big = jax.random.normal(k2, (n_big, 1), dtype=jnp.float32)
    out_big = foo_forward(x_big, w1, w2, w3, w4)
    jax.block_until_ready(out_big)
    ref_big = foo_reference(x_big, w1, w2, w3, w4)
    folded = ((w1 @ w3)[0, 0] + w2[0, 0] * jnp.sum(w4)) * jnp.sum(x_big)
    assert jnp.allclose(out_big, ref_big, rtol=1e-3, atol=1.0), (out_big, ref_big)
    assert jnp.allclose(out_big, folded, rtol=1e-3, atol=1.0), (out_big, folded)

    print("KERNEL_OK")
</pallas_src>

<mosaic_0001>
module attributes {stable_mosaic.version = 11 : i64} {
  func.func @kernel(%arg0: i32, %arg1: i32, %arg2: memref<1xf32, #tpu.memory_space<smem>>, %arg3: memref<8x128xf32, #tpu.memory_space<vmem>>, %arg4: memref<1x1x1xf32, #tpu.memory_space<vmem>>, %arg5: memref<8x128xf32, #tpu.memory_space<vmem>>) attributes {dimension_semantics = [#tpu.dimension_semantics<parallel>, #tpu.dimension_semantics<arbitrary>], iteration_bounds = array<i64: 2, 1>, scalar_prefetch = 0 : i64, scratch_operands = 1 : i64, tpu.core_type = #tpu.core_type<tc>, window_params = [{transform_indices = @transform_0, window_bounds = array<i64: 1>}, {transform_indices = @transform_1, window_bounds = array<i64: 8, 128>}, {transform_indices = @transform_2, window_bounds = array<i64: 1, 1, 1>}]} {
    %c0_i32 = arith.constant 0 : i32
    %0 = arith.cmpi eq, %arg1, %c0_i32 : i32
    %1 = arith.extui %0 : i1 to i32
    %c0_i32_0 = arith.constant 0 : i32
    %2 = arith.cmpi ne, %1, %c0_i32_0 : i32
    scf.if %2 {
      %cst = arith.constant 0.000000e+00 : f32
      %17 = vector.broadcast %cst : f32 to vector<8x128xf32>
      %c0_8 = arith.constant 0 : index
      %c0_9 = arith.constant 0 : index
      %18 = vector.load %arg5[%c0_8, %c0_9] : memref<8x128xf32, #tpu.memory_space<vmem>>, vector<8x128xf32>
      tpu.vector_store %arg5[%c0_8, %c0_9], %17 {strides = array<i32>} : memref<8x128xf32, #tpu.memory_space<vmem>>, vector<8x128xf32>,
    } else {
    }
    %c0 = arith.constant 0 : index
    %c0_1 = arith.constant 0 : index
    %3 = vector.load %arg3[%c0, %c0_1] : memref<8x128xf32, #tpu.memory_space<vmem>>, vector<8x128xf32>
    %c1_i32 = arith.constant 1 : i32
    %4 = arith.muli %arg0, %c1_i32 : i32
    %5 = arith.addi %4, %arg1 : i32
    %c1_i32_2 = arith.constant 1 : i32
    %6 = arith.addi %5, %c1_i32_2 : i32
    %c8_i32 = arith.constant 8 : i32
    %7 = arith.muli %6, %c8_i32 : i32
    %c1_i32_3 = arith.constant 1 : i32
    %8 = arith.cmpi sle, %7, %c1_i32_3 : i32
    %9 = arith.extui %8 : i1 to i32
    %c0_i32_4 = arith.constant 0 : i32
    %10 = arith.cmpi ne, %9, %c0_i32_4 : i32
    scf.if %10 {
      %c0_8 = arith.constant 0 : index
      %c0_9 = arith.constant 0 : index
      %17 = vector.load %arg5[%c0_8, %c0_9] : memref<8x128xf32, #tpu.memory_space<vmem>>, vector<8x128xf32>
      %18 = vector.shape_cast %3 : vector<8x128xf32> to vector<1x8x128xf32>
      %cst = arith.constant dense<0.000000e+00> : vector<8x128xf32>
      %19 = vector.multi_reduction <add>, %18, %cst [0] : vector<1x8x128xf32> to vector<8x128xf32>
      %20 = arith.addf %17, %19 : vector<8x128xf32>
      %c0_10 = arith.constant 0 : index
      %c0_11 = arith.constant 0 : index
      %21 = vector.load %arg5[%c0_10, %c0_11] : memref<8x128xf32, #tpu.memory_space<vmem>>, vector<8x128xf32>
      tpu.vector_store %arg5[%c0_10, %c0_11], %20 {strides = array<i32>} : memref<8x128xf32, #tpu.memory_space<vmem>>, vector<8x128xf32>,
    } else {
    }
    %true = arith.constant true
    %11 = arith.xori %8, %true : i1
    %12 = arith.extui %11 : i1 to i32
    %c0_i32_5 = arith.constant 0 : i32
    %13 = arith.cmpi ne, %12, %c0_i32_5 : i32
    scf.if %13 {
      %17 = tpu.iota {dimensions = array<i32: 0>} : vector<8x128xi32>
      %c8_i32_8 = arith.constant 8 : i32
      %18 = arith.muli %5, %c8_i32_8 : i32
      %19 = vector.broadcast %18 : i32 to vector<8x128xi32>
      %20 = arith.addi %17, %19 : vector<8x128xi32>
      %c1_i32_9 = arith.constant 1 : i32
      %21 = vector.broadcast %c1_i32_9 : i32 to vector<8x128xi32>
      %22 = arith.cmpi slt, %20, %21 : vector<8x128xi32>
      %cst = arith.constant 0.000000e+00 : f32
      %23 = vector.broadcast %cst : f32 to vector<8x128xf32>
      %24 = arith.select %22, %3, %23 : vector<8x128xi1>, vector<8x128xf32>
      %c0_10 = arith.constant 0 : index
      %c0_11 = arith.constant 0 : index
      %25 = vector.load %arg5[%c0_10, %c0_11] : memref<8x128xf32, #tpu.memory_space<vmem>>, vector<8x128xf32>
      %26 = vector.shape_cast %24 : vector<8x128xf32> to vector<1x8x128xf32>
      %cst_12 = arith.constant dense<0.000000e+00> : vector<8x128xf32>
      %27 = vector.multi_reduction <add>, %26, %cst_12 [0] : vector<1x8x128xf32> to vector<8x128xf32>
      %28 = arith.addf %25, %27 : vector<8x128xf32>
      %c0_13 = arith.constant 0 : index
      %c0_14 = arith.constant 0 : index
      %29 = vector.load %arg5[%c0_13, %c0_14] : memref<8x128xf32, #tpu.memory_space<vmem>>, vector<8x128xf32>
      tpu.vector_store %arg5[%c0_13, %c0_14], %28 {strides = array<i32>} : memref<8x128xf32, #tpu.memory_space<vmem>>, vector<8x128xf32>,
    } else {
    }
    %c0_i32_6 = arith.constant 0 : i32
    %14 = arith.cmpi eq, %arg1, %c0_i32_6 : i32
    %15 = arith.extui %14 : i1 to i32
    %c0_i32_7 = arith.constant 0 : i32
    %16 = arith.cmpi ne, %15, %c0_i32_7 : i32
    scf.if %16 {
      %c0_8 = arith.constant 0 : index
      %c0_9 = arith.constant 0 : index
      %17 = vector.load %arg5[%c0_8, %c0_9] : memref<8x128xf32, #tpu.memory_space<vmem>>, vector<8x128xf32>
      %18 = vector.shape_cast %17 : vector<8x128xf32> to vector<1x8x128xf32>
      %cst = arith.constant dense<0.000000e+00> : vector<1xf32>
      %19 = vector.multi_reduction <add>, %18, %cst [1, 2] : vector<1x8x128xf32> to vector<1xf32>
      %20 = vector.shape_cast %19 : vector<1xf32> to vector<1x1x1xf32>
      %21 = vector.extract %20[0, 0, 0] : f32 from vector<1x1x1xf32>
      %c0_10 = arith.constant 0 : index
      %22 = memref.load %arg2[%c0_10] : memref<1xf32, #tpu.memory_space<smem>>
      %23 = arith.mulf %21, %22 : f32
      %24 = vector.broadcast %23 : f32 to vector<1x1x1xf32>
      %c0_11 = arith.constant 0 : index
      %c0_12 = arith.constant 0 : index
      %c0_13 = arith.constant 0 : index
      %25 = vector.load %arg4[%c0_11, %c0_12, %c0_13] : memref<1x1x1xf32, #tpu.memory_space<vmem>>, vector<1x1x1xf32>
      tpu.vector_store %arg4[%c0_11, %c0_12, %c0_13], %24 {strides = array<i32>} : memref<1x1x1xf32, #tpu.memory_space<vmem>>, vector<1x1x1xf32>,
    } else {
    }
    return
  }
  func.func @transform_0(%arg0: i32, %arg1: i32) -> i32 {
    %c0_i32 = arith.constant 0 : i32
    %c0_i32_0 = arith.constant 0 : i32
    return %c0_i32 : i32
  }
  func.func @transform_1(%arg0: i32, %arg1: i32) -> (i32, i32) {
    %c1_i32 = arith.constant 1 : i32
    %0 = arith.muli %arg0, %c1_i32 : i32
    %1 = arith.addi %0, %arg1 : i32
    %c0_i32 = arith.constant 0 : i32
    %2 = arith.minsi %1, %c0_i32 : i32
    %c0_i32_0 = arith.constant 0 : i32
    %c0_i32_1 = arith.constant 0 : i32
    return %2, %c0_i32_0 : i32, i32
  }
  func.func @transform_2(%arg0: i32, %arg1: i32) -> (i32, i32, i32) {
    %c0_i32 = arith.constant 0 : i32
    %c0_i32_0 = arith.constant 0 : i32
    %c0_i32_1 = arith.constant 0 : i32
    return %arg0, %c0_i32, %c0_i32_0 : i32, i32, i32
  }
}

</mosaic_0001>

<bundles_post_ra>
// kernel: tpu_custom_call.1
= control target key start
LH: loop header
LB: loop body
LE: loop exit
PB: predicated region body
PF: predicated region fallthrough
CT: control target
= control target key end

     0   :  { %s369_s11 = smov 0   ;;  %s371_s12 = smov 0   ;;  %s417_s0 = inlined_call_operand.<no memory space> [shape: f32[1], index: 0, kind: input, shape index: {}]   ;;  %s418_s1 = inlined_call_operand.vmem [shape: f32[1,128], index: 1, kind: input, shape index: {}]   ;;  %s419_s2 = inlined_call_operand.vmem [shape: f32[2,1,1], index: 2, kind: output, shape index: {}]  }
   0x1   :  { %7 = sst [smem:[#allocation3]] %s417_s0  ;;  %s373_s13 = smov 0  }
   0x2 LB: > { %s25_s0 = sadd.s32 1, %s344_s12  ;;  %p289_p0 = scmp.ge.s32.totalorder %s348_s13, 1  ;;  %s348_s13 = sphi %s373_s13, %s13_s13   ;;  %s344_s12 = sphi %s371_s12, %s421_s12   ;;  %s340_s11 = sphi %s369_s11, %s420_s11  }
   0x3   : > { %p27_p1 = scmp.ge.s32.totalorder %s25_s0, 2  ;;  %p141_p2 = scmp.lt.s32.totalorder %s348_s13, 3 }
   0x5   : > { %s423_s0 = smov (%p27_p1, %s25_s0), 0  ;;  %p142_p3 = pnand %p289_p0, %p141_p2 }
   0x6   : > { %p166_p4 = scmp.lt.s32.totalorder (!%p142_p3), %s340_s11, 0  ;;  %p180_p5 = scmp.lt.s32.totalorder (!%p142_p3), %s340_s11, 1 }
   0x7   : > { %145 = sbr.rel (%p142_p3) target bundleno = 253 (0xfd), region = 28  ;;  %s297_s14 = sshll.u32 (!%p142_p3), %s340_s11, 3 }
   0x8   : > { %s298_s17 = sadd.s32 (!%p142_p3), 8, %s297_s14 }
   0x9   : > { %p292_p7 = scmp.gt.s32.totalorder (!%p142_p3), %s298_s17, 1 }
   0xc   : > { %v350_v0 = vmov 0.0   ;;  %s167_s15 = scalar_select %p166_p4, %s340_s11, 0 }
   0xd   : > { %187 = vst [vmem:[#allocation2] sm:$0xff] %v350_v0  ;;  %s425_s11 = smov (!%p180_p5, %s340_s11), 1 }
   0xe   : > { %s290_s16 = sshll.u32 %s167_s15, 3  ;;  %s182_s20 = scalar_lea.vmem %s419_s2, %s425_s11 }
   0xf   : > { %p171_p6 = scmp.lt.s32.totalorder %s290_s16, 0  ;;  %195 = sbr.rel (%p292_p7) target bundleno = 24 (0x18), region = 36 }
  0x11   : > { %s427_s16 = smov (!%p171_p6, %s290_s16), 0 }
  0x12   : > { %s173_s23 = scalar_lea.vmem %s418_s1, %s427_s16 }
  0x13   : > { %v188_v1 = vld [vmem:[%s173_s23] sm:$0xff] }
  0x14   : > { %v196_v2 = vld [vmem:[#allocation2] sm:$0xff] }
  0x15   : > { %v198_v3 = vadd.f32 %v196_v2, %v188_v1 }
  0x17   : > { %199 = vst [vmem:[#allocation2] sm:$0xff] %v198_v3 }
  0x18 PF: > { %p293_p8 = scmp.le.s32.totalorder %s298_s17, 1 }
  0x1a   : > { %203 = sbr.rel (%p293_p8) target bundleno = 42 (0x2a), region = 40 }
  0x1f   : > { %v204_v4 = vlaneseq  ;;  %v207_v5 = vstv %s297_s14  ;;  %v211_v8 = vld [vmem:[#allocation2] sm:$0xff] }
  0x21   : > { %v205_v6 = vshrl.u32 %v204_v4, 7 }
  0x23   : > { %v208_v7 = vadd.s32 %v207_v5, %v205_v6 }
  0x25   : > { %vm209_vm0 = vcmp.lt.s32.totalorder %v208_v7, 1 }
  0x26   : > { %v210_v9 = vsel %vm209_vm0, %v188_v1, 0.0 }
  0x27   : > { %v213_v10 = vadd.f32 %v211_v8, %v210_v9 }
  0x29   : > { %214 = vst [vmem:[#allocation2] sm:$0xff] %v213_v10 }
  0x2a PF: > { %s228_s24 = sld [smem:[#allocation3]]  ;;  %vm231_vm1 = vcmask 0  }
  0x30   : > { %v218_v11 = vld [vmem:[#allocation2] sm:$0xff] }
  0x31   : > { %219 = vadd.xlane.f32.xlu0 %v218_v11 }
  0xba   : > { %v220_v12 = vpop.xlane.xlu0 %219 }
  0xbb   : > { %v221_v13 = vrot.slane %v220_v12, 4 }
  0xbd   : > { %v222_v14 = vadd.f32 %v221_v13, %v220_v12 }
  0xbf   : > { %v223_v15 = vrot.slane %v222_v14, 2 }
  0xc1   : > { %v224_v16 = vadd.f32 %v223_v15, %v222_v14 }
  0xc3   : > { %v225_v17 = vrot.slane %v224_v16, 1 }
  0xc5   : > { %v226_v18 = vadd.f32 %v225_v17, %v224_v16 }
  0xc7   : > { %299 = vpush %v226_v18 }
  0xf8   : > { %s300_s25 = spop %299 }
  0xf9   : > { %s229_s26 = smul.f32 %s300_s25, %s228_s24 }
  0xfb   : > { %v230_v19 = vstv %s229_s26 }
  0xfc   : > { %232 = vst.msk [vmem:[%s182_s20] sm:$0x1] %vm231_vm1, %v230_v19 }
  0xfd PF: > { %s13_s13 = sadd.s32 1, %s348_s13   ;;  %s420_s11 = smov %s344_s12 }
  0xfe   : > { %p10_p9 = scmp.ge.s32.totalorder %s13_s13, 4   ;;  %s421_s12 = smov %s423_s0 }
 0x100   :  { %12 = sbr.rel (!%p10_p9) target bundleno = 2 (0x2), region = 74 }

</bundles_post_ra>
